<compile_context>
chip_gen: v7x
topology: tpu7x:2x2x1
jax: 0.10.0
libtpu: 0.0.40
codegen_flags: <defaults>
</compile_context>

<pallas_src>
import jax
import jax.numpy as jnp
from jax.experimental import pallas as pl
from jax.experimental.pallas import tpu as pltpu


def _round_up(x, m):
    return ((x + m - 1) // m) * m


def _pick_tile(B, tb):
    """Batch tile size: multiple of 128; >= 2 grid steps whenever B > 128."""
    tb = max(128, _round_up(tb, 128))
    if B <= 128:
        return 128
    # Cap the tile so the grid has at least 2 steps: lets the "parallel"
    # batch axis shard across both TensorCores on v7x.
    return min(tb, _round_up((B + 1) // 2, 128))


def _recsys_kernel(uidx_ref, midx_ref, scores_ref, o_ref):
    # uidx_ref / midx_ref : (1, TB) int32  — user ids / (movie ids + NU_pad)
    # scores_ref          : (1, NT) float32 — [s_u + b | s_m], lane-padded, resident
    # o_ref               : (1, TB) float32 — lane-dense output block
    nt = scores_ref.shape[1]
    tb = uidx_ref.shape[1]

    uidx = uidx_ref[...]                                        # (1, TB)
    midx = midx_ref[...]                                        # (1, TB)

    rows = jax.lax.broadcasted_iota(jnp.int32, (nt, tb), 0)     # (NT, TB)
    # Fused "two-hot": each column selects exactly one user-score row and one
    # movie-score row (movie ids are pre-offset, so the rows never collide).
    two_hot = ((rows == uidx) | (rows == midx)).astype(jnp.float32)

    y = jnp.dot(scores_ref[...], two_hot,
                preferred_element_type=jnp.float32)             # (1, TB)
    o_ref[...] = y.astype(o_ref.dtype)


def _run_kernel(u_idx, m_idx, scores, num_tiles, TB, NT, *, single_buffer_scores):
    # Resident (constant index_map) score block: single-buffer it so the
    # pipeline does not allocate a useless second copy.
    score_kwargs = (dict(pipeline_mode=pl.Buffered(1))
                    if single_buffer_scores else {})
    return pl.pallas_call(
        _recsys_kernel,
        out_shape=jax.ShapeDtypeStruct((num_tiles, TB), jnp.float32),
        grid=(num_tiles,),
        in_specs=[
            pl.BlockSpec((1, TB), lambda i: (i, 0)),                   # user id tile
            pl.BlockSpec((1, TB), lambda i: (i, 0)),                   # movie id tile
            pl.BlockSpec((1, NT), lambda i: (0, 0), **score_kwargs),   # scores (resident)
        ],
        out_specs=pl.BlockSpec((1, TB), lambda i: (i, 0)),             # lane-dense out
        compiler_params=pltpu.CompilerParams(
            dimension_semantics=("parallel",),
            # Resident scores + per-step index/output tiles + the (NT, TB)
            # two-hot intermediate stay well under 32 MiB; this clears v5e's
            # 16 MiB scoped default and fits v7x's 64 MiB physical VMEM.
            vmem_limit_bytes=32 * 1024 * 1024),
    )(u_idx, m_idx, scores)


def recsys_forward(users, movies, user_table, movie_table, W, b, *, tb=2048):
    """Pallas forward pass. users/movies: int[B]; returns float32[B, 1]."""
    B = users.shape[0]
    n_users, E = user_table.shape
    n_movies = movie_table.shape[0]

    NU = _round_up(n_users, 128)       # lane-padded score lengths
    NM = _round_up(n_movies, 128)
    NT = NU + NM

    # ---- One-time wrapper precompute (loop-invariant across the grid) ----
    w_u = W[0, :E].astype(jnp.float32)
    w_m = W[0, E:].astype(jnp.float32)
    s_u = user_table.astype(jnp.float32) @ w_u + b.reshape(())   # bias folded
    s_m = movie_table.astype(jnp.float32) @ w_m
    scores = jnp.concatenate([
        jnp.pad(s_u, (0, NU - n_users)),      # padded entries score 0
        jnp.pad(s_m, (0, NM - n_movies)),
    ]).reshape(1, NT)

    # ---- Batch tiling ----
    TB = _pick_tile(B, tb)
    B_pad = _round_up(B, TB)
    num_tiles = B_pad // TB

    # Clamp guards against OOB ids (note: PyTorch nn.Embedding would raise
    # instead of clamping) and pad to a whole number of tiles; padded rows are
    # sliced away after the kernel.
    u_idx = jnp.clip(users.astype(jnp.int32), 0, n_users - 1)
    m_idx = jnp.clip(movies.astype(jnp.int32), 0, n_movies - 1)
    u_idx = jnp.pad(u_idx, (0, B_pad - B)).reshape(num_tiles, TB)
    m_idx = (jnp.pad(m_idx, (0, B_pad - B)) + NU).reshape(num_tiles, TB)

    try:
        out = _run_kernel(u_idx, m_idx, scores, num_tiles, TB, NT,
                          single_buffer_scores=True)
    except Exception:
        # pl.Buffered(1) / pipeline_mode not available on this JAX build:
        # fall back to default double-buffering (correctness unchanged).
        out = _run_kernel(u_idx, m_idx, scores, num_tiles, TB, NT,
                          single_buffer_scores=False)

    return out.reshape(B_pad, 1)[:B]


def recsys_reference(users, movies, user_table, movie_table, W, b):
    """Plain-JAX reference mirroring the PyTorch forward."""
    u = jnp.take(user_table, users, axis=0)          # (B, E)
    m = jnp.take(movie_table, movies, axis=0)        # (B, E)
    x = jnp.concatenate([u, m], axis=1)              # (B, 2E)
    return x @ W.T + b                               # (B, 1)


if __name__ == "__main__":
    # Small, deterministic problem sizes.
    n_users, n_movies, E = 10, 15, 32

    key = jax.random.PRNGKey(0)
    k_ue, k_me, k_w, k_b, k_u, k_m = jax.random.split(key, 6)

    # nn.Embedding default init: N(0, 1)
    user_table = jax.random.normal(k_ue, (n_users, E), dtype=jnp.float32)
    movie_table = jax.random.normal(k_me, (n_movies, E), dtype=jnp.float32)

    # nn.Linear default init: U(-1/sqrt(in), 1/sqrt(in)), in = 2E
    bound = 1.0 / jnp.sqrt(jnp.float32(2 * E))
    W = jax.random.uniform(k_w, (1, 2 * E), jnp.float32, -bound, bound)
    b = jax.random.uniform(k_b, (1, 1), jnp.float32, -bound, bound)

    # Case 1: tiny batch (single 128-wide tile after padding).
    B1 = 8
    users1 = jax.random.randint(k_u, (B1,), 0, n_users, dtype=jnp.int32)
    movies1 = jax.random.randint(k_m, (B1,), 0, n_movies, dtype=jnp.int32)
    out1 = jax.block_until_ready(
        recsys_forward(users1, movies1, user_table, movie_table, W, b))
    ref1 = recsys_reference(users1, movies1, user_table, movie_table, W, b)
    assert out1.shape == (B1, 1)
    assert jnp.allclose(out1, ref1, atol=1e-5, rtol=1e-5), "mismatch (B=8)"

    # Case 2: multi-tile batch with default tiling (TB=256 -> 2 grid steps,
    # exercising the >=2-tile + padding path).
    B2 = 300
    users2 = jax.random.randint(k_u, (B2,), 0, n_users, dtype=jnp.int32)
    movies2 = jax.random.randint(k_m, (B2,), 0, n_movies, dtype=jnp.int32)
    out2 = jax.block_until_ready(
        recsys_forward(users2, movies2, user_table, movie_table, W, b))
    ref2 = recsys_reference(users2, movies2, user_table, movie_table, W, b)
    assert out2.shape == (B2, 1)
    assert jnp.allclose(out2, ref2, atol=1e-5, rtol=1e-5), "mismatch (B=300)"

    # Case 3: forced small tile (TB=128 -> 3 grid steps).
    out3 = jax.block_until_ready(
        recsys_forward(users2, movies2, user_table, movie_table, W, b, tb=128))
    assert jnp.allclose(out3, ref2, atol=1e-5, rtol=1e-5), "mismatch (B=300, tb=128)"

    print("KERNEL_OK")
</pallas_src>

<mosaic_0001>
module attributes {stable_mosaic.version = 11 : i64} {
  func.func @_recsys_kernel(%arg0: i32, %arg1: memref<1x128xi32, #tpu.memory_space<vmem>>, %arg2: memref<1x128xi32, #tpu.memory_space<vmem>>, %arg3: memref<1x256xf32, #tpu.memory_space<vmem>>, %arg4: memref<1x128xf32, #tpu.memory_space<vmem>>) attributes {dimension_semantics = [#tpu.dimension_semantics<parallel>], iteration_bounds = array<i64: 1>, scalar_prefetch = 0 : i64, scratch_operands = 0 : i64, tpu.core_type = #tpu.core_type<tc>, window_params = [{transform_indices = @transform_0, window_bounds = array<i64: 1, 128>}, {transform_indices = @transform_1, window_bounds = array<i64: 1, 128>}, {pipeline_mode = #tpu.pipeline_mode<synchronous>, transform_indices = @transform_2, window_bounds = array<i64: 1, 256>}, {transform_indices = @transform_3, window_bounds = array<i64: 1, 128>}]} {
    %c0 = arith.constant 0 : index
    %c0_0 = arith.constant 0 : index
    %0 = vector.load %arg1[%c0, %c0_0] : memref<1x128xi32, #tpu.memory_space<vmem>>, vector<1x128xi32>
    %c0_1 = arith.constant 0 : index
    %c0_2 = arith.constant 0 : index
    %1 = vector.load %arg2[%c0_1, %c0_2] : memref<1x128xi32, #tpu.memory_space<vmem>>, vector<1x128xi32>
    %2 = tpu.iota {dimensions = array<i32: 0>} : vector<256x128xi32>
    %3 = vector.broadcast %0 : vector<1x128xi32> to vector<256x128xi32>
    %4 = arith.cmpi eq, %2, %3 : vector<256x128xi32>
    %5 = vector.broadcast %1 : vector<1x128xi32> to vector<256x128xi32>
    %6 = arith.cmpi eq, %2, %5 : vector<256x128xi32>
    %7 = arith.ori %4, %6 : vector<256x128xi1>
    %8 = arith.extui %7 : vector<256x128xi1> to vector<256x128xi32>
    %9 = arith.sitofp %8 : vector<256x128xi32> to vector<256x128xf32>
    %c0_3 = arith.constant 0 : index
    %c0_4 = arith.constant 0 : index
    %10 = vector.load %arg3[%c0_3, %c0_4] : memref<1x256xf32, #tpu.memory_space<vmem>>, vector<1x256xf32>
    %cst = arith.constant dense<0.000000e+00> : vector<1x128xf32>
    %11 = tpu.matmul %10, %9, %cst {dimension_numbers = #tpu.dot_dimension_numbers<[1], [0], [0], [1], [0, 0, 1, 1], [], []>} : vector<1x256xf32>, vector<256x128xf32>, vector<1x128xf32> -> vector<1x128xf32>
    %c0_5 = arith.constant 0 : index
    %c0_6 = arith.constant 0 : index
    %12 = vector.load %arg4[%c0_5, %c0_6] : memref<1x128xf32, #tpu.memory_space<vmem>>, vector<1x128xf32>
    tpu.vector_store %arg4[%c0_5, %c0_6], %11 {strides = array<i32>} : memref<1x128xf32, #tpu.memory_space<vmem>>, vector<1x128xf32>,
    return
  }
  func.func @transform_0(%arg0: i32) -> (i32, i32) {
    %c0_i32 = arith.constant 0 : i32
    %c0_i32_0 = arith.constant 0 : i32
    return %arg0, %c0_i32 : i32, i32
  }
  func.func @transform_1(%arg0: i32) -> (i32, i32) {
    %c0_i32 = arith.constant 0 : i32
    %c0_i32_0 = arith.constant 0 : i32
    return %arg0, %c0_i32 : i32, i32
  }
  func.func @transform_2(%arg0: i32) -> (i32, i32) {
    %c0_i32 = arith.constant 0 : i32
    %c0_i32_0 = arith.constant 0 : i32
    %c0_i32_1 = arith.constant 0 : i32
    return %c0_i32, %c0_i32_0 : i32, i32
  }
  func.func @transform_3(%arg0: i32) -> (i32, i32) {
    %c0_i32 = arith.constant 0 : i32
    %c0_i32_0 = arith.constant 0 : i32
    return %arg0, %c0_i32 : i32, i32
  }
}

module attributes {stable_mosaic.version = 11 : i64} {
  func.func @_recsys_kernel(%arg0: i32, %arg1: memref<1x128xi32, #tpu.memory_space<vmem>>, %arg2: memref<1x128xi32, #tpu.memory_space<vmem>>, %arg3: memref<1x256xf32, #tpu.memory_space<vmem>>, %arg4: memref<1x128xf32, #tpu.memory_space<vmem>>) attributes {dimension_semantics = [#tpu.dimension_semantics<parallel>], iteration_bounds = array<i64: 1>, scalar_prefetch = 0 : i64, scratch_operands = 0 : i64, tpu.core_type = #tpu.core_type<tc>, window_params = [{transform_indices = @transform_0, window_bounds = array<i64: 1, 128>}, {transform_indices = @transform_1, window_bounds = array<i64: 1, 128>}, {pipeline_mode = #tpu.pipeline_mode<synchronous>, transform_indices = @transform_2, window_bounds = array<i64: 1, 256>}, {transform_indices = @transform_3, window_bounds = array<i64: 1, 128>}]} {
    %c0 = arith.constant 0 : index
    %c0_0 = arith.constant 0 : index
    %0 = vector.load %arg1[%c0, %c0_0] : memref<1x128xi32, #tpu.memory_space<vmem>>, vector<1x128xi32>
    %c0_1 = arith.constant 0 : index
    %c0_2 = arith.constant 0 : index
    %1 = vector.load %arg2[%c0_1, %c0_2] : memref<1x128xi32, #tpu.memory_space<vmem>>, vector<1x128xi32>
    %2 = tpu.iota {dimensions = array<i32: 0>} : vector<256x128xi32>
    %3 = vector.broadcast %0 : vector<1x128xi32> to vector<256x128xi32>
    %4 = arith.cmpi eq, %2, %3 : vector<256x128xi32>
    %5 = vector.broadcast %1 : vector<1x128xi32> to vector<256x128xi32>
    %6 = arith.cmpi eq, %2, %5 : vector<256x128xi32>
    %7 = arith.ori %4, %6 : vector<256x128xi1>
    %8 = arith.extui %7 : vector<256x128xi1> to vector<256x128xi32>
    %9 = arith.sitofp %8 : vector<256x128xi32> to vector<256x128xf32>
    %c0_3 = arith.constant 0 : index
    %c0_4 = arith.constant 0 : index
    %10 = vector.load %arg3[%c0_3, %c0_4] : memref<1x256xf32, #tpu.memory_space<vmem>>, vector<1x256xf32>
    %cst = arith.constant dense<0.000000e+00> : vector<1x128xf32>
    %11 = tpu.matmul %10, %9, %cst {dimension_numbers = #tpu.dot_dimension_numbers<[1], [0], [0], [1], [0, 0, 1, 1], [], []>} : vector<1x256xf32>, vector<256x128xf32>, vector<1x128xf32> -> vector<1x128xf32>
    %c0_5 = arith.constant 0 : index
    %c0_6 = arith.constant 0 : index
    %12 = vector.load %arg4[%c0_5, %c0_6] : memref<1x128xf32, #tpu.memory_space<vmem>>, vector<1x128xf32>
    tpu.vector_store %arg4[%c0_5, %c0_6], %11 {strides = array<i32>} : memref<1x128xf32, #tpu.memory_space<vmem>>, vector<1x128xf32>,
    return
  }
  func.func @transform_0(%arg0: i32) -> (i32, i32) {
    %c0_i32 = arith.constant 0 : i32
    %c0_i32_0 = arith.constant 0 : i32
    return %arg0, %c0_i32 : i32, i32
  }
  func.func @transform_1(%arg0: i32) -> (i32, i32) {
    %c0_i32 = arith.constant 0 : i32
    %c0_i32_0 = arith.constant 0 : i32
    return %arg0, %c0_i32 : i32, i32
  }
  func.func @transform_2(%arg0: i32) -> (i32, i32) {
    %c0_i32 = arith.constant 0 : i32
    %c0_i32_0 = arith.constant 0 : i32
    %c0_i32_1 = arith.constant 0 : i32
    return %c0_i32, %c0_i32_0 : i32, i32
  }
  func.func @transform_3(%arg0: i32) -> (i32, i32) {
    %c0_i32 = arith.constant 0 : i32
    %c0_i32_0 = arith.constant 0 : i32
    return %arg0, %c0_i32 : i32, i32
  }
}

</mosaic_0001>

<bundles_post_ra>
// kernel: tpu_custom_call.1
= control target key start
LH: loop header
LB: loop body
LE: loop exit
PB: predicated region body
PF: predicated region fallthrough
CT: control target
= control target key end

     0   :  { %8 = vsyncpa [#allocation3], 0  ;;  %s690_s0 = inlined_call_operand.hbm [shape: s32[1,128], index: 0, kind: input, shape index: {}]   ;;  %s691_s1 = inlined_call_operand.vmem [shape: s32[1,128], index: 1, kind: input, shape index: {}]   ;;  %s692_s2 = inlined_call_operand.vmem [shape: f32[1,256], index: 2, kind: input, shape index: {}]   ;;  %s693_s3 = inlined_call_operand.hbm [shape: f32[1,128], index: 3, kind: output, shape index: {}]  }
   0x1   :  { %9 = vsyncpa [#allocation4], 0  ;;  %s512_s12 = smov [#allocation2]   ;;  %s464_s16 = scalar_lea.hbm %s690_s0, 16 }
   0x2   :  { %s16_s13 = sshll.u32 %s512_s12, 4  ;;  %p465_p0 = scmp.ne.s32.totalorder %s690_s0, %s464_s16  ;;  %s17_s13 = int_to_ptr.vmem [resolvable:$true] %s16_s13 }
   0x3   :  { %p468_p1 = scmp.lt.u32.totalorder %s464_s16, %s690_s0 }
   0x5   :  { %p470_p2 = pnand %p468_p1, %p465_p0 }
   0x7   :  { %473 = shalt.err (!%p470_p2)
}
   0x8   :  { %s474_s21 = scalar_lea.vmem %s17_s13, 16  ;;  %s478_s22 = scalar_lea.vmem %s17_s13, 32 }
   0x9   :  { %p475_p3 = scmp.ne.s32.totalorder %s17_s13, %s474_s21  ;;  %p479_p4 = scmp.lt.s32.totalorder %s17_s13, %s17_s13 }
   0xa   :  { %p480_p5 = scmp.lt.s32.totalorder %s478_s22, %s474_s21 }
   0xc   :  { %p481_p6 = por %p480_p5, %p479_p4 }
   0xe   :  { %p482_p7 = pnand %p481_p6, %p475_p3 }
  0x10   :  { %485 = shalt.err (!%p482_p7)
}
  0x11   :  { %19 = dma.hbm_to_vmem [thread:$0]  %s690_s0, 16, %s17_s13, [#allocation3]  }
  0x12   :  { %508 = dma.done.wait [#allocation3], 16  }
  0x13   :  { %509 = vsyncadd [#allocation3], 4294967280  ;;  %v29_v0 = vlaneseq  ;;  %v552_v5 = vld [vmem:[#allocation2] ss:$0 sm:$0xff]  ;;  %v557_v6 = vld [vmem:[%s691_s1] ss:$0 sm:$0xff] }
  0x14   :  { %v513_v10 = vmov 1.0|1.0   ;;  %v614_v22 = vld [vmem:[%s692_s2] sm:$0x3]  ;;  %s514_s2 = smov [#allocation5]  }
  0x15   :  { %v547_v1 = vshrl.u32 %v29_v0, 7  ;;  %s319_s27 = sshll.u32 %s514_s2, 4  ;;  %s320_s27 = int_to_ptr.vmem [resolvable:$true] %s319_s27 }
  0x16   :  { %s486_s28 = scalar_lea.vmem %s320_s27, 16  ;;  %s490_s29 = scalar_lea.vmem %s320_s27, 32 }
  0x17   :  { %v46_v2 = vadd.s32 128, %v547_v1  ;;  %v47_v3 = vadd.s32 136, %v547_v1  ;;  %v31_v4 = vadd.s32 8, %v547_v1  ;;  %v48_v7 = vadd.s32 144, %v547_v1  ;;  %p487_p8 = scmp.ne.s32.totalorder %s320_s27, %s486_s28  ;;  %p491_p9 = scmp.lt.s32.totalorder %s320_s27, %s320_s27 }
  0x18   :  { %vm66_vm5 = vcmp.eq.s32.totalorder %v547_v1, %v552_v5  ;;  %vm102_vm6 = vcmp.eq.s32.totalorder %v547_v1, %v557_v6  ;;  %v49_v8 = vadd.s32 152, %v547_v1  ;;  %v32_v9 = vadd.s32 16, %v547_v1  ;;  %p492_p10 = scmp.lt.s32.totalorder %s490_s29, %s486_s28 }
  0x19   :  { %vm82_vm0 = vcmp.eq.s32.totalorder %v46_v2, %v552_v5  ;;  %vm83_vm1 = vcmp.eq.s32.totalorder %v47_v3, %v552_v5  ;;  %vm118_vm2 = vcmp.eq.s32.totalorder %v46_v2, %v557_v6  ;;  %vm119_vm3 = vcmp.eq.s32.totalorder %v47_v3, %v557_v6  ;;  %vm134_vm11 = vmor %vm66_vm5, %vm102_vm6 }
  0x1a   :  { %vm150_vm4 = vmor %vm82_vm0, %vm118_vm2  ;;  %vm67_vm8 = vcmp.eq.s32.totalorder %v31_v4, %v552_v5  ;;  %vm103_vm9 = vcmp.eq.s32.totalorder %v31_v4, %v557_v6  ;;  %vm84_vm12 = vcmp.eq.s32.totalorder %v48_v7, %v552_v5  ;;  %vm120_vm13 = vcmp.eq.s32.totalorder %v48_v7, %v557_v6  ;;  %p493_p11 = por %p492_p10, %p491_p9 }
  0x1b   :  { %vm151_vm7 = vmor %vm83_vm1, %vm119_vm3  ;;  %v33_v11 = vadd.s32 24, %v547_v1  ;;  %vm85_vm15 = vcmp.eq.s32.totalorder %v49_v8, %v552_v5  ;;  %vm121_vm0 = vcmp.eq.s32.totalorder %v49_v8, %v557_v6  ;;  %v50_v12 = vadd.s32 160, %v547_v1 }
  0x1c   :  { %vm429_vm10 = vmpackc.low %vm151_vm7, %vm150_vm4  ;;  %vm68_vm3 = vcmp.eq.s32.totalorder %v32_v9, %v552_v5  ;;  %vm104_vm4 = vcmp.eq.s32.totalorder %v32_v9, %v557_v6  ;;  %v51_v13 = vadd.s32 168, %v547_v1  ;;  %v34_v14 = vadd.s32 32, %v547_v1  ;;  %p494_p12 = pnand %p493_p11, %p487_p8 }
  0x1d   :  { %430 = vmatprep.subr.msk.bf16.mxu0 %vm429_vm10, %v513_v10  ;;  %vm135_vm14 = vmor %vm67_vm8, %vm103_vm9  ;;  %vm69_vm6 = vcmp.eq.s32.totalorder %v33_v11, %v552_v5  ;;  %vm105_vm7 = vcmp.eq.s32.totalorder %v33_v11, %v557_v6  ;;  %vm86_vm10 = vcmp.eq.s32.totalorder %v50_v12, %v552_v5  ;;  %v35_v15 = vadd.s32 40, %v547_v1 }
  0x1e   :  { %vm431_vm1 = vmpackc.low %vm135_vm14, %vm134_vm11  ;;  %vm122_vm11 = vcmp.eq.s32.totalorder %v50_v12, %v557_v6  ;;  %vm123_vm14 = vcmp.eq.s32.totalorder %v51_v13, %v557_v6  ;;  %v52_v16 = vadd.s32 176, %v547_v1  ;;  %v53_v17 = vadd.s32 184, %v547_v1 }
  0x1f   :  { %432 = vmatpush3.bf16.msk.msra.mxu0 %vm431_vm1, %v513_v10  ;;  %vm152_vm2 = vmor %vm84_vm12, %vm120_vm13  ;;  %vm87_vm13 = vcmp.eq.s32.totalorder %v51_v13, %v552_v5  ;;  %vm70_vm1 = vcmp.eq.s32.totalorder %v34_v14, %v552_v5  ;;  %v36_v18 = vadd.s32 48, %v547_v1  ;;  %v37_v19 = vadd.s32 56, %v547_v1 }
  0x20   :  { %vm153_vm5 = vmor %vm85_vm15, %vm121_vm0  ;;  %v54_v20 = vadd.s32 192, %v547_v1  ;;  %v55_v21 = vadd.s32 200, %v547_v1  ;;  %v238_v23 = vsub.s32 1, %v547_v1  ;;  %v38_v24 = vadd.s32 64, %v547_v1 }
  0x21   :  { %vm433_vm8 = vmpackc.low %vm153_vm5, %vm152_vm2  ;;  %vm106_vm2 = vcmp.eq.s32.totalorder %v34_v14, %v557_v6  ;;  %vm107_vm5 = vcmp.eq.s32.totalorder %v35_v15, %v557_v6  ;;  %v39_v25 = vadd.s32 72, %v547_v1  ;;  %v56_v27 = vadd.s32 208, %v547_v1 }
  0x22   :  { %434 = vmatprep.subr.msk.bf16.mxu0 %vm433_vm8, %v513_v10  ;;  %vm136_vm9 = vmor %vm68_vm3, %vm104_vm4  ;;  %vm71_vm4 = vcmp.eq.s32.totalorder %v35_v15, %v552_v5  ;;  %vm88_vm8 = vcmp.eq.s32.totalorder %v52_v16, %v552_v5  ;;  %v239_v26 = vrot.slane %v614_v22, %v238_v23  ;;  %v57_v28 = vadd.s32 216, %v547_v1 }
  0x23   :  { %vm137_vm12 = vmor %vm69_vm6, %vm105_vm7  ;;  %v40_v29 = vadd.s32 80, %v547_v1  ;;  %v41_v30 = vadd.s32 88, %v547_v1  ;;  %v58_v31 = vadd.s32 224, %v547_v1  ;;  %v59_v32 = vadd.s32 232, %v547_v1 }
  0x24   :  { %vm435_vm15 = vmpackc.low %vm137_vm12, %vm136_vm9  ;;  %vm124_vm9 = vcmp.eq.s32.totalorder %v52_v16, %v557_v6  ;;  %vm125_vm12 = vcmp.eq.s32.totalorder %v53_v17, %v557_v6  ;;  %306 = vmatprep.mubr.f32.mxu0 %v239_v26  ;;  %v42_v33 = vadd.s32 96, %v547_v1  ;;  %v43_v34 = vadd.s32 104, %v547_v1 }
  0x25   :  { %436 = vmatpush3.bf16.msk.msra.mxu0 %vm435_vm15, %v513_v10  ;;  %vm154_vm0 = vmor %vm86_vm10, %vm122_vm11  ;;  %vm89_vm11 = vcmp.eq.s32.totalorder %v53_v17, %v552_v5  ;;  %vm72_vm15 = vcmp.eq.s32.totalorder %v36_v18, %v552_v5  ;;  %v60_v35 = vadd.s32 240, %v547_v1  ;;  %v61_v36 = vadd.s32 248, %v547_v1 }
  0x26   :  { %vm155_vm3 = vmor %vm87_vm13, %vm123_vm14  ;;  %v44_v37 = vadd.s32 112, %v547_v1  ;;  %v45_v38 = vadd.s32 120, %v547_v1  ;;  %v234_v39 = vsub.s32 0, %v547_v1 }
  0x27   :  { %vm437_vm6 = vmpackc.low %vm155_vm3, %vm154_vm0  ;;  %vm108_vm0 = vcmp.eq.s32.totalorder %v36_v18, %v557_v6  ;;  %vm109_vm3 = vcmp.eq.s32.totalorder %v37_v19, %v557_v6 }
  0x28   :  { %438 = vmatprep.subr.msk.bf16.mxu0 %vm437_vm6, %v513_v10  ;;  %vm138_vm7 = vmor %vm70_vm1, %vm106_vm2  ;;  %vm73_vm2 = vcmp.eq.s32.totalorder %v37_v19, %v552_v5  ;;  %vm90_vm6 = vcmp.eq.s32.totalorder %v54_v20, %v552_v5  ;;  %v235_v40 = vrot.slane %v614_v22, %v234_v39 }
  0x29   :  { %vm139_vm10 = vmor %vm71_vm4, %vm107_vm5 }
  0x2a   :  { %vm439_vm13 = vmpackc.low %vm139_vm10, %vm138_vm7  ;;  %vm126_vm7 = vcmp.eq.s32.totalorder %v54_v20, %v557_v6  ;;  %vm127_vm10 = vcmp.eq.s32.totalorder %v55_v21, %v557_v6 }
  0x2b   :  { %440 = vmatpush3.bf16.msk.msra.mxu0 %vm439_vm13, %v513_v10  ;;  %vm156_vm14 = vmor %vm88_vm8, %vm124_vm9  ;;  %vm91_vm9 = vcmp.eq.s32.totalorder %v55_v21, %v552_v5  ;;  %vm74_vm13 = vcmp.eq.s32.totalorder %v38_v24, %v552_v5 }
  0x2c   :  { %vm157_vm1 = vmor %vm89_vm11, %vm125_vm12 }
  0x2d   :  { %vm441_vm4 = vmpackc.low %vm157_vm1, %vm156_vm14  ;;  %vm110_vm14 = vcmp.eq.s32.totalorder %v38_v24, %v557_v6  ;;  %vm111_vm1 = vcmp.eq.s32.totalorder %v39_v25, %v557_v6 }
  0x2e   :  { %442 = vmatprep.subr.msk.bf16.mxu0 %vm441_vm4, %v513_v10  ;;  %vm140_vm5 = vmor %vm72_vm15, %vm108_vm0  ;;  %vm75_vm0 = vcmp.eq.s32.totalorder %v39_v25, %v552_v5  ;;  %vm92_vm4 = vcmp.eq.s32.totalorder %v56_v27, %v552_v5 }
  0x2f   :  { %vm141_vm8 = vmor %vm73_vm2, %vm109_vm3 }
  0x30   :  { %vm443_vm11 = vmpackc.low %vm141_vm8, %vm140_vm5  ;;  %vm128_vm5 = vcmp.eq.s32.totalorder %v56_v27, %v557_v6  ;;  %vm129_vm8 = vcmp.eq.s32.totalorder %v57_v28, %v557_v6 }
  0x31   :  { %444 = vmatpush3.bf16.msk.msra.mxu0 %vm443_vm11, %v513_v10  ;;  %vm158_vm12 = vmor %vm90_vm6, %vm126_vm7  ;;  %vm93_vm7 = vcmp.eq.s32.totalorder %v57_v28, %v552_v5  ;;  %vm76_vm11 = vcmp.eq.s32.totalorder %v40_v29, %v552_v5 }
  0x32   :  { %vm159_vm15 = vmor %vm91_vm9, %vm127_vm10 }
  0x33   :  { %vm445_vm2 = vmpackc.low %vm159_vm15, %vm158_vm12  ;;  %vm112_vm12 = vcmp.eq.s32.totalorder %v40_v29, %v557_v6  ;;  %vm113_vm15 = vcmp.eq.s32.totalorder %v41_v30, %v557_v6 }
  0x34   :  { %446 = vmatprep.subr.msk.bf16.mxu0 %vm445_vm2, %v513_v10  ;;  %vm142_vm3 = vmor %vm74_vm13, %vm110_vm14  ;;  %vm77_vm14 = vcmp.eq.s32.totalorder %v41_v30, %v552_v5  ;;  %vm94_vm2 = vcmp.eq.s32.totalorder %v58_v31, %v552_v5 }
  0x35   :  { %vm143_vm6 = vmor %vm75_vm0, %vm111_vm1 }
  0x36   :  { %vm447_vm9 = vmpackc.low %vm143_vm6, %vm142_vm3  ;;  %vm130_vm3 = vcmp.eq.s32.totalorder %v58_v31, %v557_v6  ;;  %vm131_vm6 = vcmp.eq.s32.totalorder %v59_v32, %v557_v6 }
  0x37   :  { %448 = vmatpush3.bf16.msk.msra.mxu0 %vm447_vm9, %v513_v10  ;;  %vm160_vm10 = vmor %vm92_vm4, %vm128_vm5  ;;  %vm95_vm5 = vcmp.eq.s32.totalorder %v59_v32, %v552_v5  ;;  %vm78_vm9 = vcmp.eq.s32.totalorder %v42_v33, %v552_v5 }
  0x38   :  { %vm161_vm13 = vmor %vm93_vm7, %vm129_vm8 }
  0x39   :  { %vm449_vm0 = vmpackc.low %vm161_vm13, %vm160_vm10  ;;  %vm114_vm10 = vcmp.eq.s32.totalorder %v42_v33, %v557_v6  ;;  %vm115_vm13 = vcmp.eq.s32.totalorder %v43_v34, %v557_v6 }
  0x3a   :  { %450 = vmatprep.subr.msk.bf16.mxu0 %vm449_vm0, %v513_v10  ;;  %vm144_vm1 = vmor %vm76_vm11, %vm112_vm12  ;;  %vm79_vm12 = vcmp.eq.s32.totalorder %v43_v34, %v552_v5  ;;  %vm96_vm0 = vcmp.eq.s32.totalorder %v60_v35, %v552_v5 }
  0x3b   :  { %vm145_vm4 = vmor %vm77_vm14, %vm113_vm15 }
  0x3c   :  { %vm451_vm7 = vmpackc.low %vm145_vm4, %vm144_vm1  ;;  %vm132_vm1 = vcmp.eq.s32.totalorder %v60_v35, %v557_v6  ;;  %vm133_vm4 = vcmp.eq.s32.totalorder %v61_v36, %v557_v6 }
  0x3d   :  { %452 = vmatpush3.bf16.msk.msra.mxu0 %vm451_vm7, %v513_v10  ;;  %vm162_vm8 = vmor %vm94_vm2, %vm130_vm3  ;;  %vm97_vm3 = vcmp.eq.s32.totalorder %v61_v36, %v552_v5  ;;  %vm80_vm7 = vcmp.eq.s32.totalorder %v44_v37, %v552_v5 }
  0x3e   :  { %vm163_vm11 = vmor %vm95_vm5, %vm131_vm6 }
  0x3f   :  { %vm453_vm14 = vmpackc.low %vm163_vm11, %vm162_vm8  ;;  %vm116_vm8 = vcmp.eq.s32.totalorder %v44_v37, %v557_v6  ;;  %vm117_vm11 = vcmp.eq.s32.totalorder %v45_v38, %v557_v6 }
  0x40   :  { %454 = vmatprep.subr.msk.bf16.mxu0 %vm453_vm14, %v513_v10  ;;  %vm146_vm15 = vmor %vm78_vm9, %vm114_vm10  ;;  %vm81_vm10 = vcmp.eq.s32.totalorder %v45_v38, %v552_v5 }
  0x41   :  { %vm147_vm2 = vmor %vm79_vm12, %vm115_vm13 }
  0x42   :  { %vm455_vm5 = vmpackc.low %vm147_vm2, %vm146_vm15 }
  0x43   :  { %456 = vmatpush3.bf16.msk.msra.mxu0 %vm455_vm5, %v513_v10  ;;  %vm164_vm6 = vmor %vm96_vm0, %vm132_vm1 }
  0x44   :  { %vm165_vm9 = vmor %vm97_vm3, %vm133_vm4 }
  0x45   :  { %vm457_vm12 = vmpackc.low %vm165_vm9, %vm164_vm6 }
  0x46   :  { %458 = vmatprep.subr.msk.bf16.mxu0 %vm457_vm12, %v513_v10  ;;  %vm148_vm13 = vmor %vm80_vm7, %vm116_vm8 }
  0x47   :  { %vm149_vm14 = vmor %vm81_vm10, %vm117_vm11 }
  0x48   :  { %vm459_vm15 = vmpackc.low %vm149_vm14, %vm148_vm13 }
  0x49   :  { %460 = vmatpush3.bf16.msk.msra.mxu0 %vm459_vm15, %v513_v10 }
  0x4c   :  { %307 = vmatmul.mubr.f32.vlgmr.msra.gmra.mrb[0].mxu0 %v235_v40 }
 0x11f   :  { %v426_v41 = vpop.f32.mrb[0].mxu0 }
 0x120   :  { %v427_v42 = vpop.f32.mrb[1].mxu0 }
 0x121   :  { %v428_v43 = vadd.f32 %v427_v42, %v426_v41 }
 0x123   :  { %312 = vst [vmem:[#allocation5] sm:$0x1] %v428_v43 }
 0x124   :  { %497 = shalt.err (!%p494_p12)
}
 0x125   :  { %s498_s5 = scalar_lea.hbm %s693_s3, 16 }
 0x126   :  { %p499_p13 = scmp.ne.s32.totalorder %s693_s3, %s498_s5  ;;  %p502_p0 = scmp.lt.u32.totalorder %s498_s5, %s693_s3 }
 0x128   :  { %p504_p1 = pnand %p502_p0, %p499_p13 }
 0x12a   :  { %507 = shalt.err (!%p504_p1)
}
 0x12b   :  { %322 = dma.vmem_to_hbm [thread:$0]  %s320_s27, 16, %s693_s3, [#allocation4]  }
 0x12c   :  { %510 = dma.done.wait [#allocation4], 16  }
 0x12d   :  { %511 = vsyncadd [#allocation4], 4294967280 }
 0x12e   :  { %326 = vsyncpa [#allocation3], 1 }
 0x12f   :  { %327 = vsyncpa [#allocation4], 1 }

// kernel: tpu_custom_call.1
= control target key start
LH: loop header
LB: loop body
LE: loop exit
PB: predicated region body
PF: predicated region fallthrough
CT: control target
= control target key end

     0   :  { %8 = vsyncpa [#allocation3], 0  ;;  %s690_s0 = inlined_call_operand.hbm [shape: s32[1,128], index: 0, kind: input, shape index: {}]   ;;  %s691_s1 = inlined_call_operand.vmem [shape: s32[1,128], index: 1, kind: input, shape index: {}]   ;;  %s692_s2 = inlined_call_operand.vmem [shape: f32[1,256], index: 2, kind: input, shape index: {}]   ;;  %s693_s3 = inlined_call_operand.hbm [shape: f32[1,128], index: 3, kind: output, shape index: {}]  }
   0x1   :  { %9 = vsyncpa [#allocation4], 0  ;;  %s512_s12 = smov [#allocation2]   ;;  %s464_s16 = scalar_lea.hbm %s690_s0, 16 }
   0x2   :  { %s16_s13 = sshll.u32 %s512_s12, 4  ;;  %p465_p0 = scmp.ne.s32.totalorder %s690_s0, %s464_s16  ;;  %s17_s13 = int_to_ptr.vmem [resolvable:$true] %s16_s13 }
   0x3   :  { %p468_p1 = scmp.lt.u32.totalorder %s464_s16, %s690_s0 }
   0x5   :  { %p470_p2 = pnand %p468_p1, %p465_p0 }
   0x7   :  { %473 = shalt.err (!%p470_p2)
}
   0x8   :  { %s474_s21 = scalar_lea.vmem %s17_s13, 16  ;;  %s478_s22 = scalar_lea.vmem %s17_s13, 32 }
   0x9   :  { %p475_p3 = scmp.ne.s32.totalorder %s17_s13, %s474_s21  ;;  %p479_p4 = scmp.lt.s32.totalorder %s17_s13, %s17_s13 }
   0xa   :  { %p480_p5 = scmp.lt.s32.totalorder %s478_s22, %s474_s21 }
   0xc   :  { %p481_p6 = por %p480_p5, %p479_p4 }
   0xe   :  { %p482_p7 = pnand %p481_p6, %p475_p3 }
  0x10   :  { %485 = shalt.err (!%p482_p7)
}
  0x11   :  { %19 = dma.hbm_to_vmem [thread:$0]  %s690_s0, 16, %s17_s13, [#allocation3]  }
  0x12   :  { %508 = dma.done.wait [#allocation3], 16  }
  0x13   :  { %509 = vsyncadd [#allocation3], 4294967280  ;;  %v29_v0 = vlaneseq  ;;  %v552_v5 = vld [vmem:[#allocation2] ss:$0 sm:$0xff]  ;;  %v557_v6 = vld [vmem:[%s691_s1] ss:$0 sm:$0xff] }
  0x14   :  { %v513_v10 = vmov 1.0|1.0   ;;  %v614_v22 = vld [vmem:[%s692_s2] sm:$0x3]  ;;  %s514_s2 = smov [#allocation5]  }
  0x15   :  { %v547_v1 = vshrl.u32 %v29_v0, 7  ;;  %s319_s27 = sshll.u32 %s514_s2, 4  ;;  %s320_s27 = int_to_ptr.vmem [resolvable:$true] %s319_s27 }
  0x16   :  { %s486_s28 = scalar_lea.vmem %s320_s27, 16  ;;  %s490_s29 = scalar_lea.vmem %s320_s27, 32 }
  0x17   :  { %v46_v2 = vadd.s32 128, %v547_v1  ;;  %v47_v3 = vadd.s32 136, %v547_v1  ;;  %v31_v4 = vadd.s32 8, %v547_v1  ;;  %v48_v7 = vadd.s32 144, %v547_v1  ;;  %p487_p8 = scmp.ne.s32.totalorder %s320_s27, %s486_s28  ;;  %p491_p9 = scmp.lt.s32.totalorder %s320_s27, %s320_s27 }
  0x18   :  { %vm66_vm5 = vcmp.eq.s32.totalorder %v547_v1, %v552_v5  ;;  %vm102_vm6 = vcmp.eq.s32.totalorder %v547_v1, %v557_v6  ;;  %v49_v8 = vadd.s32 152, %v547_v1  ;;  %v32_v9 = vadd.s32 16, %v547_v1  ;;  %p492_p10 = scmp.lt.s32.totalorder %s490_s29, %s486_s28 }
  0x19   :  { %vm82_vm0 = vcmp.eq.s32.totalorder %v46_v2, %v552_v5  ;;  %vm83_vm1 = vcmp.eq.s32.totalorder %v47_v3, %v552_v5  ;;  %vm118_vm2 = vcmp.eq.s32.totalorder %v46_v2, %v557_v6  ;;  %vm119_vm3 = vcmp.eq.s32.totalorder %v47_v3, %v557_v6  ;;  %vm134_vm11 = vmor %vm66_vm5, %vm102_vm6 }
  0x1a   :  { %vm150_vm4 = vmor %vm82_vm0, %vm118_vm2  ;;  %vm67_vm8 = vcmp.eq.s32.totalorder %v31_v4, %v552_v5  ;;  %vm103_vm9 = vcmp.eq.s32.totalorder %v31_v4, %v557_v6  ;;  %vm84_vm12 = vcmp.eq.s32.totalorder %v48_v7, %v552_v5  ;;  %vm120_vm13 = vcmp.eq.s32.totalorder %v48_v7, %v557_v6  ;;  %p493_p11 = por %p492_p10, %p491_p9 }
  0x1b   :  { %vm151_vm7 = vmor %vm83_vm1, %vm119_vm3  ;;  %v33_v11 = vadd.s32 24, %v547_v1  ;;  %vm85_vm15 = vcmp.eq.s32.totalorder %v49_v8, %v552_v5  ;;  %vm121_vm0 = vcmp.eq.s32.totalorder %v49_v8, %v557_v6  ;;  %v50_v12 = vadd.s32 160, %v547_v1 }
  0x1c   :  { %vm429_vm10 = vmpackc.low %vm151_vm7, %vm150_vm4  ;;  %vm68_vm3 = vcmp.eq.s32.totalorder %v32_v9, %v552_v5  ;;  %vm104_vm4 = vcmp.eq.s32.totalorder %v32_v9, %v557_v6  ;;  %v51_v13 = vadd.s32 168, %v547_v1  ;;  %v34_v14 = vadd.s32 32, %v547_v1  ;;  %p494_p12 = pnand %p493_p11, %p487_p8 }
  0x1d   :  { %430 = vmatprep.subr.msk.bf16.mxu0 %vm429_vm10, %v513_v10  ;;  %vm135_vm14 = vmor %vm67_vm8, %vm103_vm9  ;;  %vm69_vm6 = vcmp.eq.s32.totalorder %v33_v11, %v552_v5  ;;  %vm105_vm7 = vcmp.eq.s32.totalorder %v33_v11, %v557_v6  ;;  %vm86_vm10 = vcmp.eq.s32.totalorder %v50_v12, %v552_v5  ;;  %v35_v15 = vadd.s32 40, %v547_v1 }
  0x1e   :  { %vm431_vm1 = vmpackc.low %vm135_vm14, %vm134_vm11  ;;  %vm122_vm11 = vcmp.eq.s32.totalorder %v50_v12, %v557_v6  ;;  %vm123_vm14 = vcmp.eq.s32.totalorder %v51_v13, %v557_v6  ;;  %v52_v16 = vadd.s32 176, %v547_v1  ;;  %v53_v17 = vadd.s32 184, %v547_v1 }
  0x1f   :  { %432 = vmatpush3.bf16.msk.msra.mxu0 %vm431_vm1, %v513_v10  ;;  %vm152_vm2 = vmor %vm84_vm12, %vm120_vm13  ;;  %vm87_vm13 = vcmp.eq.s32.totalorder %v51_v13, %v552_v5  ;;  %vm70_vm1 = vcmp.eq.s32.totalorder %v34_v14, %v552_v5  ;;  %v36_v18 = vadd.s32 48, %v547_v1  ;;  %v37_v19 = vadd.s32 56, %v547_v1 }
  0x20   :  { %vm153_vm5 = vmor %vm85_vm15, %vm121_vm0  ;;  %v54_v20 = vadd.s32 192, %v547_v1  ;;  %v55_v21 = vadd.s32 200, %v547_v1  ;;  %v238_v23 = vsub.s32 1, %v547_v1  ;;  %v38_v24 = vadd.s32 64, %v547_v1 }
  0x21   :  { %vm433_vm8 = vmpackc.low %vm153_vm5, %vm152_vm2  ;;  %vm106_vm2 = vcmp.eq.s32.totalorder %v34_v14, %v557_v6  ;;  %vm107_vm5 = vcmp.eq.s32.totalorder %v35_v15, %v557_v6  ;;  %v39_v25 = vadd.s32 72, %v547_v1  ;;  %v56_v27 = vadd.s32 208, %v547_v1 }
  0x22   :  { %434 = vmatprep.subr.msk.bf16.mxu0 %vm433_vm8, %v513_v10  ;;  %vm136_vm9 = vmor %vm68_vm3, %vm104_vm4  ;;  %vm71_vm4 = vcmp.eq.s32.totalorder %v35_v15, %v552_v5  ;;  %vm88_vm8 = vcmp.eq.s32.totalorder %v52_v16, %v552_v5  ;;  %v239_v26 = vrot.slane %v614_v22, %v238_v23  ;;  %v57_v28 = vadd.s32 216, %v547_v1 }
  0x23   :  { %vm137_vm12 = vmor %vm69_vm6, %vm105_vm7  ;;  %v40_v29 = vadd.s32 80, %v547_v1  ;;  %v41_v30 = vadd.s32 88, %v547_v1  ;;  %v58_v31 = vadd.s32 224, %v547_v1  ;;  %v59_v32 = vadd.s32 232, %v547_v1 }
  0x24   :  { %vm435_vm15 = vmpackc.low %vm137_vm12, %vm136_vm9  ;;  %vm124_vm9 = vcmp.eq.s32.totalorder %v52_v16, %v557_v6  ;;  %vm125_vm12 = vcmp.eq.s32.totalorder %v53_v17, %v557_v6  ;;  %306 = vmatprep.mubr.f32.mxu0 %v239_v26  ;;  %v42_v33 = vadd.s32 96, %v547_v1  ;;  %v43_v34 = vadd.s32 104, %v547_v1 }
  0x25   :  { %436 = vmatpush3.bf16.msk.msra.mxu0 %vm435_vm15, %v513_v10  ;;  %vm154_vm0 = vmor %vm86_vm10, %vm122_vm11  ;;  %vm89_vm11 = vcmp.eq.s32.totalorder %v53_v17, %v552_v5  ;;  %vm72_vm15 = vcmp.eq.s32.totalorder %v36_v18, %v552_v5  ;;  %v60_v35 = vadd.s32 240, %v547_v1  ;;  %v61_v36 = vadd.s32 248, %v547_v1 }
  0x26   :  { %vm155_vm3 = vmor %vm87_vm13, %vm123_vm14  ;;  %v44_v37 = vadd.s32 112, %v547_v1  ;;  %v45_v38 = vadd.s32 120, %v547_v1  ;;  %v234_v39 = vsub.s32 0, %v547_v1 }
  0x27   :  { %vm437_vm6 = vmpackc.low %vm155_vm3, %vm154_vm0  ;;  %vm108_vm0 = vcmp.eq.s32.totalorder %v36_v18, %v557_v6  ;;  %vm109_vm3 = vcmp.eq.s32.totalorder %v37_v19, %v557_v6 }
  0x28   :  { %438 = vmatprep.subr.msk.bf16.mxu0 %vm437_vm6, %v513_v10  ;;  %vm138_vm7 = vmor %vm70_vm1, %vm106_vm2  ;;  %vm73_vm2 = vcmp.eq.s32.totalorder %v37_v19, %v552_v5  ;;  %vm90_vm6 = vcmp.eq.s32.totalorder %v54_v20, %v552_v5  ;;  %v235_v40 = vrot.slane %v614_v22, %v234_v39 }
  0x29   :  { %vm139_vm10 = vmor %vm71_vm4, %vm107_vm5 }
  0x2a   :  { %vm439_vm13 = vmpackc.low %vm139_vm10, %vm138_vm7  ;;  %vm126_vm7 = vcmp.eq.s32.totalorder %v54_v20, %v557_v6  ;;  %vm127_vm10 = vcmp.eq.s32.totalorder %v55_v21, %v557_v6 }
  0x2b   :  { %440 = vmatpush3.bf16.msk.msra.mxu0 %vm439_vm13, %v513_v10  ;;  %vm156_vm14 = vmor %vm88_vm8, %vm124_vm9  ;;  %vm91_vm9 = vcmp.eq.s32.totalorder %v55_v21, %v552_v5  ;;  %vm74_vm13 = vcmp.eq.s32.totalorder %v38_v24, %v552_v5 }
  0x2c   :  { %vm157_vm1 = vmor %vm89_vm11, %vm125_vm12 }
  0x2d   :  { %vm441_vm4 = vmpackc.low %vm157_vm1, %vm156_vm14  ;;  %vm110_vm14 = vcmp.eq.s32.totalorder %v38_v24, %v557_v6  ;;  %vm111_vm1 = vcmp.eq.s32.totalorder %v39_v25, %v557_v6 }
  0x2e   :  { %442 = vmatprep.subr.msk.bf16.mxu0 %vm441_vm4, %v513_v10  ;;  %vm140_vm5 = vmor %vm72_vm15, %vm108_vm0  ;;  %vm75_vm0 = vcmp.eq.s32.totalorder %v39_v25, %v552_v5  ;;  %vm92_vm4 = vcmp.eq.s32.totalorder %v56_v27, %v552_v5 }
  0x2f   :  { %vm141_vm8 = vmor %vm73_vm2, %vm109_vm3 }
  0x30   :  { %vm443_vm11 = vmpackc.low %vm141_vm8, %vm140_vm5  ;;  %vm128_vm5 = vcmp.eq.s32.totalorder %v56_v27, %v557_v6  ;;  %vm129_vm8 = vcmp.eq.s32.totalorder %v57_v28, %v557_v6 }
  0x31   :  { %444 = vmatpush3.bf16.msk.msra.mxu0 %vm443_vm11, %v513_v10  ;;  %vm158_vm12 = vmor %vm90_vm6, %vm126_vm7  ;;  %vm93_vm7 = vcmp.eq.s32.totalorder %v57_v28, %v552_v5  ;;  %vm76_vm11 = vcmp.eq.s32.totalorder %v40_v29, %v552_v5 }
  0x32   :  { %vm159_vm15 = vmor %vm91_vm9, %vm127_vm10 }
  0x33   :  { %vm445_vm2 = vmpackc.low %vm159_vm15, %vm158_vm12  ;;  %vm112_vm12 = vcmp.eq.s32.totalorder %v40_v29, %v557_v6  ;;  %vm113_vm15 = vcmp.eq.s32.totalorder %v41_v30, %v557_v6 }
  0x34   :  { %446 = vmatprep.subr.msk.bf16.mxu0 %vm445_vm2, %v513_v10  ;;  %vm142_vm3 = vmor %vm74_vm13, %vm110_vm14  ;;  %vm77_vm14 = vcmp.eq.s32.totalorder %v41_v30, %v552_v5  ;;  %vm94_vm2 = vcmp.eq.s32.totalorder %v58_v31, %v552_v5 }
  0x35   :  { %vm143_vm6 = vmor %vm75_vm0, %vm111_vm1 }
  0x36   :  { %vm447_vm9 = vmpackc.low %vm143_vm6, %vm142_vm3  ;;  %vm130_vm3 = vcmp.eq.s32.totalorder %v58_v31, %v557_v6  ;;  %vm131_vm6 = vcmp.eq.s32.totalorder %v59_v32, %v557_v6 }
  0x37   :  { %448 = vmatpush3.bf16.msk.msra.mxu0 %vm447_vm9, %v513_v10  ;;  %vm160_vm10 = vmor %vm92_vm4, %vm128_vm5  ;;  %vm95_vm5 = vcmp.eq.s32.totalorder %v59_v32, %v552_v5  ;;  %vm78_vm9 = vcmp.eq.s32.totalorder %v42_v33, %v552_v5 }
  0x38   :  { %vm161_vm13 = vmor %vm93_vm7, %vm129_vm8 }
  0x39   :  { %vm449_vm0 = vmpackc.low %vm161_vm13, %vm160_vm10  ;;  %vm114_vm10 = vcmp.eq.s32.totalorder %v42_v33, %v557_v6  ;;  %vm115_vm13 = vcmp.eq.s32.totalorder %v43_v34, %v557_v6 }
  0x3a   :  { %450 = vmatprep.subr.msk.bf16.mxu0 %vm449_vm0, %v513_v10  ;;  %vm144_vm1 = vmor %vm76_vm11, %vm112_vm12  ;;  %vm79_vm12 = vcmp.eq.s32.totalorder %v43_v34, %v552_v5  ;;  %vm96_vm0 = vcmp.eq.s32.totalorder %v60_v35, %v552_v5 }
  0x3b   :  { %vm145_vm4 = vmor %vm77_vm14, %vm113_vm15 }
  0x3c   :  { %vm451_vm7 = vmpackc.low %vm145_vm4, %vm144_vm1  ;;  %vm132_vm1 = vcmp.eq.s32.totalorder %v60_v35, %v557_v6  ;;  %vm133_vm4 = vcmp.eq.s32.totalorder %v61_v36, %v557_v6 }
  0x3d   :  { %452 = vmatpush3.bf16.msk.msra.mxu0 %vm451_vm7, %v513_v10  ;;  %vm162_vm8 = vmor %vm94_vm2, %vm130_vm3  ;;  %vm97_vm3 = vcmp.eq.s32.totalorder %v61_v36, %v552_v5  ;;  %vm80_vm7 = vcmp.eq.s32.totalorder %v44_v37, %v552_v5 }
  0x3e   :  { %vm163_vm11 = vmor %vm95_vm5, %vm131_vm6 }
  0x3f   :  { %vm453_vm14 = vmpackc.low %vm163_vm11, %vm162_vm8  ;;  %vm116_vm8 = vcmp.eq.s32.totalorder %v44_v37, %v557_v6  ;;  %vm117_vm11 = vcmp.eq.s32.totalorder %v45_v38, %v557_v6 }
  0x40   :  { %454 = vmatprep.subr.msk.bf16.mxu0 %vm453_vm14, %v513_v10  ;;  %vm146_vm15 = vmor %vm78_vm9, %vm114_vm10  ;;  %vm81_vm10 = vcmp.eq.s32.totalorder %v45_v38, %v552_v5 }
  0x41   :  { %vm147_vm2 = vmor %vm79_vm12, %vm115_vm13 }
  0x42   :  { %vm455_vm5 = vmpackc.low %vm147_vm2, %vm146_vm15 }
  0x43   :  { %456 = vmatpush3.bf16.msk.msra.mxu0 %vm455_vm5, %v513_v10  ;;  %vm164_vm6 = vmor %vm96_vm0, %vm132_vm1 }
  0x44   :  { %vm165_vm9 = vmor %vm97_vm3, %vm133_vm4 }
  0x45   :  { %vm457_vm12 = vmpackc.low %vm165_vm9, %vm164_vm6 }
  0x46   :  { %458 = vmatprep.subr.msk.bf16.mxu0 %vm457_vm12, %v513_v10  ;;  %vm148_vm13 = vmor %vm80_vm7, %vm116_vm8 }
  0x47   :  { %vm149_vm14 = vmor %vm81_vm10, %vm117_vm11 }
  0x48   :  { %vm459_vm15 = vmpackc.low %vm149_vm14, %vm148_vm13 }
  0x49   :  { %460 = vmatpush3.bf16.msk.msra.mxu0 %vm459_vm15, %v513_v10 }
  0x4c   :  { %307 = vmatmul.mubr.f32.vlgmr.msra.gmra.mrb[0].mxu0 %v235_v40 }
 0x11f   :  { %v426_v41 = vpop.f32.mrb[0].mxu0 }
 0x120   :  { %v427_v42 = vpop.f32.mrb[1].mxu0 }
 0x121   :  { %v428_v43 = vadd.f32 %v427_v42, %v426_v41 }
 0x123   :  { %312 = vst [vmem:[#allocation5] sm:$0x1] %v428_v43 }
 0x124   :  { %497 = shalt.err (!%p494_p12)
}
 0x125   :  { %s498_s5 = scalar_lea.hbm %s693_s3, 16 }
 0x126   :  { %p499_p13 = scmp.ne.s32.totalorder %s693_s3, %s498_s5  ;;  %p502_p0 = scmp.lt.u32.totalorder %s498_s5, %s693_s3 }
 0x128   :  { %p504_p1 = pnand %p502_p0, %p499_p13 }
 0x12a   :  { %507 = shalt.err (!%p504_p1)
}
 0x12b   :  { %322 = dma.vmem_to_hbm [thread:$0]  %s320_s27, 16, %s693_s3, [#allocation4]  }
 0x12c   :  { %510 = dma.done.wait [#allocation4], 16  }
 0x12d   :  { %511 = vsyncadd [#allocation4], 4294967280 }
 0x12e   :  { %326 = vsyncpa [#allocation3], 1 }
 0x12f   :  { %327 = vsyncpa [#allocation4], 1 }

</bundles_post_ra>
